<compile_context>
chip_gen: v7x
topology: tpu7x:2x2x1
jax: 0.10.0
libtpu: 0.0.40
codegen_flags: <defaults>
</compile_context>

<pallas_src>
import functools

import jax
import jax.numpy as jnp
from jax.experimental import pallas as pl
from jax.experimental.pallas import tpu as pltpu


def layernorm_kernel(x_ref, ss_ref, o_ref, *, eps, emb_dim):
    x = x_ref[...].astype(jnp.float32)                  # (tile_rows, emb_dim) f32
    n = float(emb_dim)
    s = jnp.sum(x, axis=-1, keepdims=True)
    sq = jnp.sum(x * x, axis=-1, keepdims=True)
    mean = s * (1.0 / n)
    # torch.var(dim=-1) default unbiased=True -> divide by (emb_dim - 1).
    # This matches the custom module as written (intentionally NOT the biased
    # variance of nn.LayerNorm).
    var = (sq - n * mean * mean) * (1.0 / (n - 1.0))
    inv_std = jax.lax.rsqrt(var + eps)                  # EUP slot, ~free
    scale = ss_ref[0:1, :]                              # (1, emb_dim), already f32
    shift = ss_ref[1:2, :]
    o_ref[...] = ((x - mean) * inv_std * scale + shift).astype(o_ref.dtype)


def _tpu_budgets():
    """Returns (block_budget_bytes, vmem_limit_cap_bytes, min_grid_steps)."""
    vmem_cap = 64 << 20   # conservative default: assume v7x-class (64 MiB / TC)
    num_tc = 1
    try:
        info = pltpu.get_tpu_info()
        vmem_cap = int(getattr(info, "vmem_capacity_bytes", vmem_cap) or vmem_cap)
    except Exception:
        pass
    try:
        kind = jax.devices()[0].device_kind.lower()
        if "v7" in kind:
            num_tc = 2
    except Exception:
        pass
    if vmem_cap >= (96 << 20) and num_tc == 1:
        # v5e / v6e: 128 MiB VMEM, single TensorCore per chip.
        return 64 << 20, 96 << 20, 1
    # v7x-class (or unknown): 64 MiB VMEM per TC, 2 TCs share the chip.
    return 22 << 20, 48 << 20, 2


def _pick_tile_rows(rows, emb_dim, in_bytes, block_budget, min_grid_steps):
    """Largest row tile whose double-buffered in/out blocks plus in-kernel f32
    temps fit `block_budget`, with (a) a bounded divisor search (no tiny-tile
    degeneration; fall through to a cdiv grid + masked tail instead) and
    (b) at least `min_grid_steps` grid steps so multi-TC chips can shard the
    parallel row axis."""
    # 2x double-buffered input + 2x double-buffered output (input dtype) plus
    # ~2 full-tile f32 temps inside the kernel (x.astype(f32) + one live temp).
    per_row_bytes = emb_dim * (4 * in_bytes + 2 * 4)
    max_tile = max(8, int(block_budget // per_row_bytes))
    if min_grid_steps > 1 and rows >= 16 * min_grid_steps:
        max_tile = min(max_tile, max(8, (rows // min_grid_steps) // 8 * 8))
    if rows <= max_tile:
        return rows  # single (or per-core) block; full-extent dims are legal
    max_tile = max(8, (max_tile // 8) * 8)
    # Only accept exact divisors within 2x of the target tile; a cdiv grid
    # with one masked ragged-tail block beats a 10-100x larger grid.
    t = max_tile
    floor = max(8, max_tile // 2)
    while t >= floor:
        if rows % t == 0:
            return t
        t -= 8
    return max_tile  # cdiv grid; tail block handled by Pallas OOB masking


def layer_norm(x, scale, shift, *, eps=1e-5, tile_rows=None):
    """x: (..., emb_dim); scale, shift: (emb_dim,)."""
    orig_shape = x.shape
    emb_dim = orig_shape[-1]
    x2d = x.reshape(-1, emb_dim)
    rows = x2d.shape[0]
    in_bytes = jnp.dtype(x.dtype).itemsize

    block_budget, vmem_limit_cap, min_grid_steps = _tpu_budgets()
    if tile_rows is None:
        tile_rows = _pick_tile_rows(rows, emb_dim, in_bytes, block_budget,
                                    min_grid_steps)
    tile_rows = max(1, min(tile_rows, rows))

    grid = (pl.cdiv(rows, tile_rows),)

    # Resident (2, emb_dim) scale/shift, pre-cast to f32 (never re-DMA'd and
    # no per-step casts in the kernel body).
    ss = jnp.stack([scale, shift], axis=0).astype(jnp.float32).reshape(2, emb_dim)

    # Scoped VMEM sized from what the kernel actually holds: double-buffered
    # in/out blocks in the input dtype plus full-tile f32 temps, plus slack;
    # capped per generation (48 MiB on v7x, 96 MiB on v5e/v6e).
    block_in_bytes = tile_rows * emb_dim * in_bytes
    block_f32_bytes = tile_rows * emb_dim * 4
    vmem_need = 4 * block_in_bytes + 2 * block_f32_bytes + (2 << 20)
    vmem_limit = int(min(vmem_limit_cap, max(16 << 20, vmem_need)))

    # TODO(synk): for emb_dim < 128 (the toy demo's 32) the lane axis is mostly
    # wasted and output stores are masked vst.msk; real model widths
    # (multiples of 128) are lane-dense and unaffected.
    kernel = functools.partial(layernorm_kernel, eps=eps, emb_dim=emb_dim)

    out = pl.pallas_call(
        kernel,
        out_shape=jax.ShapeDtypeStruct((rows, emb_dim), x.dtype),
        grid_spec=pltpu.PrefetchScalarGridSpec(
            num_scalar_prefetch=0,
            grid=grid,
            in_specs=[
                pl.BlockSpec((tile_rows, emb_dim), lambda i: (i, 0)),
                pl.BlockSpec((2, emb_dim), lambda i: (0, 0)),
            ],
            out_specs=pl.BlockSpec((tile_rows, emb_dim), lambda i: (i, 0)),
        ),
        compiler_params=pltpu.CompilerParams(
            dimension_semantics=("parallel",),
            vmem_limit_bytes=vmem_limit,
        ),
    )(x2d, ss)

    return out.reshape(orig_shape)


def _reference(x, scale, shift, eps=1e-5):
    emb_dim = x.shape[-1]
    mean = jnp.mean(x, axis=-1, keepdims=True)
    var = jnp.sum((x - mean) ** 2, axis=-1, keepdims=True) / (emb_dim - 1)
    return scale * ((x - mean) / jnp.sqrt(var + eps)) + shift


if __name__ == "__main__":
    # Primary case, matching the module's toy shapes (batch=2, seq=8, emb=32).
    batch, seq, emb_dim = 2, 8, 32
    key = jax.random.PRNGKey(0)
    x = jax.random.normal(key, (batch, seq, emb_dim), dtype=jnp.float32)
    scale = jnp.ones((emb_dim,), dtype=jnp.float32)   # nn.Parameter(torch.ones)
    shift = jnp.zeros((emb_dim,), dtype=jnp.float32)  # nn.Parameter(torch.zeros)

    out = jax.block_until_ready(layer_norm(x, scale, shift))
    ref = _reference(x, scale, shift)
    assert jnp.allclose(out, ref, atol=1e-5, rtol=1e-5), "mismatch (primary)"

    # Lane-dense emb_dim=128, forced small tile: exercises the exact multi-block
    # grid path with non-trivial scale/shift.
    b2, s2, d2 = 2, 16, 128
    x2 = jax.random.normal(jax.random.PRNGKey(1), (b2, s2, d2), dtype=jnp.float32)
    sc2 = 1.0 + 0.1 * jax.random.normal(jax.random.PRNGKey(2), (d2,), jnp.float32)
    sh2 = 0.1 * jax.random.normal(jax.random.PRNGKey(3), (d2,), jnp.float32)
    out2 = jax.block_until_ready(layer_norm(x2, sc2, sh2, tile_rows=8))
    ref2 = _reference(x2, sc2, sh2)
    assert jnp.allclose(out2, ref2, atol=1e-5, rtol=1e-5), "mismatch (tiled)"

    # Ragged-tail case: rows=24 not divisible by tile_rows=16 -> cdiv grid with
    # a masked tail block (row-independent, so OOB rows never affect outputs).
    b3, s3, d3 = 2, 12, 128
    x3 = jax.random.normal(jax.random.PRNGKey(4), (b3, s3, d3), dtype=jnp.float32)
    out3 = jax.block_until_ready(layer_norm(x3, sc2, sh2, tile_rows=16))
    ref3 = _reference(x3, sc2, sh2)
    assert jnp.allclose(out3, ref3, atol=1e-5, rtol=1e-5), "mismatch (ragged)"

    print("KERNEL_OK")
</pallas_src>

<mosaic_0001>
module attributes {stable_mosaic.version = 11 : i64} {
  func.func @layernorm_kernel(%arg0: i32, %arg1: memref<16x32xf32, #tpu.memory_space<vmem>>, %arg2: memref<2x32xf32, #tpu.memory_space<vmem>>, %arg3: memref<16x32xf32, #tpu.memory_space<vmem>>) attributes {dimension_semantics = [#tpu.dimension_semantics<parallel>], iteration_bounds = array<i64: 1>, scalar_prefetch = 0 : i64, scratch_operands = 0 : i64, tpu.core_type = #tpu.core_type<tc>, window_params = [{transform_indices = @transform_0, window_bounds = array<i64: 16, 32>}, {pipeline_mode = #tpu.pipeline_mode<synchronous>, transform_indices = @transform_1, window_bounds = array<i64: 2, 32>}, {transform_indices = @transform_2, window_bounds = array<i64: 16, 32>}]} {
    %c0 = arith.constant 0 : index
    %c0_0 = arith.constant 0 : index
    %0 = vector.load %arg1[%c0, %c0_0] : memref<16x32xf32, #tpu.memory_space<vmem>>, vector<16x32xf32>
    %cst = arith.constant dense<0.000000e+00> : vector<16xf32>
    %1 = vector.multi_reduction <add>, %0, %cst [1] : vector<16x32xf32> to vector<16xf32>
    %2 = vector.shape_cast %1 : vector<16xf32> to vector<16x1xf32>
    %3 = arith.mulf %0, %0 : vector<16x32xf32>
    %cst_1 = arith.constant dense<0.000000e+00> : vector<16xf32>
    %4 = vector.multi_reduction <add>, %3, %cst_1 [1] : vector<16x32xf32> to vector<16xf32>
    %5 = vector.shape_cast %4 : vector<16xf32> to vector<16x1xf32>
    %cst_2 = arith.constant 3.125000e-02 : f32
    %6 = vector.broadcast %cst_2 : f32 to vector<16x1xf32>
    %7 = arith.mulf %2, %6 : vector<16x1xf32>
    %cst_3 = arith.constant 3.200000e+01 : f32
    %8 = vector.broadcast %cst_3 : f32 to vector<16x1xf32>
    %9 = arith.mulf %8, %7 : vector<16x1xf32>
    %10 = arith.mulf %9, %7 : vector<16x1xf32>
    %11 = arith.subf %5, %10 : vector<16x1xf32>
    %cst_4 = arith.constant 0.0322580636 : f32
    %12 = vector.broadcast %cst_4 : f32 to vector<16x1xf32>
    %13 = arith.mulf %11, %12 : vector<16x1xf32>
    %cst_5 = arith.constant 9.99999974E-6 : f32
    %14 = vector.broadcast %cst_5 : f32 to vector<16x1xf32>
    %15 = arith.addf %13, %14 : vector<16x1xf32>
    %16 = math.rsqrt %15 : vector<16x1xf32>
    %c0_6 = arith.constant 0 : index
    %c0_7 = arith.constant 0 : index
    %17 = vector.load %arg2[%c0_6, %c0_7] : memref<2x32xf32, #tpu.memory_space<vmem>>, vector<1x32xf32>
    %c1 = arith.constant 1 : index
    %c0_8 = arith.constant 0 : index
    %18 = vector.load %arg2[%c1, %c0_8] : memref<2x32xf32, #tpu.memory_space<vmem>>, vector<1x32xf32>
    %19 = vector.broadcast %7 : vector<16x1xf32> to vector<16x32xf32>
    %20 = arith.subf %0, %19 : vector<16x32xf32>
    %21 = vector.broadcast %16 : vector<16x1xf32> to vector<16x32xf32>
    %22 = arith.mulf %20, %21 : vector<16x32xf32>
    %23 = vector.broadcast %17 : vector<1x32xf32> to vector<16x32xf32>
    %24 = arith.mulf %22, %23 : vector<16x32xf32>
    %25 = vector.broadcast %18 : vector<1x32xf32> to vector<16x32xf32>
    %26 = arith.addf %24, %25 : vector<16x32xf32>
    %c0_9 = arith.constant 0 : index
    %c0_10 = arith.constant 0 : index
    %27 = vector.load %arg3[%c0_9, %c0_10] : memref<16x32xf32, #tpu.memory_space<vmem>>, vector<16x32xf32>
    tpu.vector_store %arg3[%c0_9, %c0_10], %26 {strides = array<i32>} : memref<16x32xf32, #tpu.memory_space<vmem>>, vector<16x32xf32>,
    return
  }
  func.func @transform_0(%arg0: i32) -> (i32, i32) {
    %c0_i32 = arith.constant 0 : i32
    %c0_i32_0 = arith.constant 0 : i32
    return %arg0, %c0_i32 : i32, i32
  }
  func.func @transform_1(%arg0: i32) -> (i32, i32) {
    %c0_i32 = arith.constant 0 : i32
    %c0_i32_0 = arith.constant 0 : i32
    %c0_i32_1 = arith.constant 0 : i32
    return %c0_i32, %c0_i32_0 : i32, i32
  }
  func.func @transform_2(%arg0: i32) -> (i32, i32) {
    %c0_i32 = arith.constant 0 : i32
    %c0_i32_0 = arith.constant 0 : i32
    return %arg0, %c0_i32 : i32, i32
  }
}

</mosaic_0001>

<bundles_post_ra>
// kernel: tpu_custom_call.1
= control target key start
LH: loop header
LB: loop body
LE: loop exit
PB: predicated region body
PF: predicated region fallthrough
CT: control target
= control target key end

     0   :  { %7 = vsyncpa [#allocation3], 0  ;;  %s213_s0 = inlined_call_operand.hbm [shape: f32[16,32], index: 0, kind: input, shape index: {}]   ;;  %s214_s1 = inlined_call_operand.vmem [shape: f32[2,32], index: 1, kind: input, shape index: {}]   ;;  %s215_s2 = inlined_call_operand.hbm [shape: f32[16,32], index: 2, kind: output, shape index: {}]  }
   0x1   :  { %8 = vsyncpa [#allocation4], 0  ;;  %s152_s9 = smov [#allocation2]   ;;  %s104_s13 = scalar_lea.hbm %s213_s0, 256 }
   0x2   :  { %s14_s10 = sshll.u32 %s152_s9, 4  ;;  %p105_p0 = scmp.ne.s32.totalorder %s213_s0, %s104_s13  ;;  %s15_s10 = int_to_ptr.vmem [resolvable:$true] %s14_s10 }
   0x3   :  { %p108_p1 = scmp.lt.u32.totalorder %s104_s13, %s213_s0 }
   0x5   :  { %p110_p2 = pnand %p108_p1, %p105_p0 }
   0x7   :  { %113 = shalt.err (!%p110_p2)
}
   0x8   :  { %s114_s18 = scalar_lea.vmem %s15_s10, 256  ;;  %p119_p4 = scmp.lt.s32.totalorder %s15_s10, %s15_s10 }
   0x9   :  { %p115_p3 = scmp.ne.s32.totalorder %s15_s10, %s114_s18  ;;  %p120_p5 = scmp.lt.s32.totalorder %s114_s18, %s114_s18 }
   0xb   :  { %p121_p6 = por %p120_p5, %p119_p4 }
   0xd   :  { %p122_p7 = pnand %p121_p6, %p115_p3 }
   0xf   :  { %125 = shalt.err (!%p122_p7)
}
  0x10   :  { %s153_s19 = smov 128   ;;  %s154_s20 = smov 8  }
  0x11   :  { %20 = dma.hbm_to_vmem [thread:$0]  %s213_s0, 256, %s15_s10, [#allocation3], %s153_s19, %s153_s19, %s154_s20  }
  0x12   :  { %148 = dma.done.wait [#allocation3], 256  }
  0x13   :  { %149 = vsyncadd [#allocation3], 4294967040  ;;  %vm28_vm0 = vcmask 261120   ;;  %v26_v0 = vld [vmem:[#allocation2] sm:$0xff]  ;;  %v27_v1 = vld [vmem:[#allocation2 + $0x8] sm:$0xff]  ;;  %s155_s26 = smov [#allocation5]  }
  0x14   :  { %v29_v2 = vsel %vm28_vm0, %v26_v0, 0.0  ;;  %v35_v3 = vmul.f32 %v26_v0, %v26_v0  ;;  %v36_v4 = vmul.f32 %v27_v1, %v27_v1  ;;  %v32_v5 = vsel %vm28_vm0, %v27_v1, 0.0  ;;  %v94_v26 = vld [vmem:[%s214_s1] ss:$0 sm:$0xff]  ;;  %v95_v28 = vld [vmem:[%s214_s1 + $0x1] ss:$0 sm:$0xff] }
  0x15   :  { %30 = vadd.xlane.f32.xlu0 %v29_v2  ;;  %s82_s27 = sshll.u32 %s155_s26, 4  ;;  %s83_s27 = int_to_ptr.vmem [resolvable:$true] %s82_s27 }
  0x16   :  { %v37_v6 = vsel %vm28_vm0, %v35_v3, 0.0  ;;  %v40_v7 = vsel %vm28_vm0, %v36_v4, 0.0  ;;  %s126_s28 = scalar_lea.vmem %s83_s27, 256  ;;  %p131_p9 = scmp.lt.s32.totalorder %s83_s27, %s83_s27 }
  0x17   :  { %38 = vadd.xlane.f32.xlu1 %v37_v6  ;;  %p127_p8 = scmp.ne.s32.totalorder %s83_s27, %s126_s28  ;;  %p132_p10 = scmp.lt.s32.totalorder %s126_s28, %s126_s28 }
  0x19   :  { %33 = vadd.xlane.f32.xlu0 %v32_v5  ;;  %p133_p11 = por %p132_p10, %p131_p9 }
  0x1b   :  { %41 = vadd.xlane.f32.xlu1 %v40_v7  ;;  %p134_p12 = pnand %p133_p11, %p127_p8 }
  0xa2   :  { %v31_v8 = vpop.xlane.xlu0 %30 }
  0xa3   :  { %v43_v9 = vmul.f32 0.03125, %v31_v8 }
  0xa4   :  { %v39_v10 = vpop.xlane.xlu1 %38 }
  0xa5   :  { %v45_v11 = vmul.f32 32.0, %v43_v9  ;;  %v59_v24 = vsub.f32 %v26_v0, %v43_v9 }
  0xa6   :  { %v34_v12 = vpop.xlane.xlu0 %33 }
  0xa7   :  { %v44_v13 = vmul.f32 0.03125, %v34_v12  ;;  %v47_v14 = vmul.f32 %v45_v11, %v43_v9 }
  0xa8   :  { %v42_v17 = vpop.xlane.xlu1 %41 }
  0xa9   :  { %v46_v15 = vmul.f32 32.0, %v44_v13  ;;  %v49_v16 = vsub.f32 %v39_v10, %v47_v14  ;;  %v60_v29 = vsub.f32 %v27_v1, %v44_v13 }
  0xab   :  { %v51_v18 = vmul.f32 0.032258064, %v49_v16  ;;  %v48_v19 = vmul.f32 %v46_v15, %v44_v13 }
  0xad   :  { %v53_v20 = vadd.f32 1e-05, %v51_v18  ;;  %v50_v21 = vsub.f32 %v42_v17, %v48_v19 }
  0xaf   :  { %100 = vrsqrt.f32 %v53_v20  ;;  %v52_v22 = vmul.f32 0.032258064, %v50_v21 }
  0xb1   :  { %v54_v23 = vadd.f32 1e-05, %v52_v22 }
  0xb3   :  { %102 = vrsqrt.f32 %v54_v23 }
  0xb9   :  { %v101_v25 = vpop.eup %100 }
  0xba   :  { %v61_v27 = vmul.f32 %v101_v25, %v59_v24 }
  0xbc   :  { %v67_v30 = vmul.f32 %v94_v26, %v61_v27 }
  0xbd   :  { %v103_v31 = vpop.eup %102 }
  0xbe   :  { %v62_v32 = vmul.f32 %v103_v31, %v60_v29  ;;  %v73_v33 = vadd.f32 %v95_v28, %v67_v30 }
  0xc0   :  { %v68_v34 = vmul.f32 %v94_v26, %v62_v32  ;;  %75 = vst.msk [vmem:[#allocation5] sm:$0xff] %vm28_vm0, %v73_v33 }
  0xc2   :  { %v74_v35 = vadd.f32 %v95_v28, %v68_v34 }
  0xc4   :  { %76 = vst.msk [vmem:[#allocation5 + $0x8] sm:$0xff] %vm28_vm0, %v74_v35 }
  0xc5   :  { %137 = shalt.err (!%p134_p12)
}
  0xc6   :  { %s138_s30 = scalar_lea.hbm %s215_s2, 256 }
  0xc7   :  { %p139_p13 = scmp.ne.s32.totalorder %s215_s2, %s138_s30  ;;  %p142_p0 = scmp.lt.u32.totalorder %s138_s30, %s215_s2 }
  0xc9   :  { %p144_p1 = pnand %p142_p0, %p139_p13 }
  0xcb   :  { %147 = shalt.err (!%p144_p1)
}
  0xcc   :  { %88 = dma.vmem_to_hbm [thread:$0]  %s83_s27, 256, %s215_s2, [#allocation4], %s153_s19, %s153_s19, %s154_s20  }
  0xcd   :  { %150 = dma.done.wait [#allocation4], 256  }
  0xce   :  { %151 = vsyncadd [#allocation4], 4294967040 }
  0xcf   :  { %92 = vsyncpa [#allocation3], 1 }
  0xd0   :  { %93 = vsyncpa [#allocation4], 1 }

</bundles_post_ra>
